<compile_context>
chip_gen: v7x
topology: tpu7x:2x2x1
jax: 0.10.0
libtpu: 0.0.40
codegen_flags: <defaults>
</compile_context>

<pallas_src>
import functools

import numpy as np
import jax
import jax.numpy as jnp
from jax.experimental import pallas as pl
from jax.experimental.pallas import tpu as pltpu


def _interp_matrix_np(in_size, out_size):
    """(out_size, in_size) weights matching PyTorch bilinear, align_corners=False."""
    d = np.arange(out_size, dtype=np.float64)
    src = (d + 0.5) * (float(in_size) / float(out_size)) - 0.5
    src = np.maximum(src, 0.0)                        # PyTorch clamps below only
    i0 = np.floor(src).astype(np.int64)
    i1 = np.minimum(i0 + 1, in_size - 1)
    f = src - i0
    m = np.zeros((out_size, in_size), dtype=np.float64)
    m[np.arange(out_size), i0] += 1.0 - f
    m[np.arange(out_size), i1] += f                   # i0==i1 at the edge -> sums to 1
    return m.astype(np.float32)


def _upsample_kernel(x_ref, ah_ref, awt_ref, o_ref, *, C, H, Ho):
    # x_ref  : (C*H,  W)   one batch element, channels stacked on the sublane axis
    # ah_ref : (Ho, H)     height-interp matrix
    # awt_ref: (W,  Wo)    width-interp matrix, transposed
    # o_ref  : (C*Ho, Wo)
    xv = x_ref[...].astype(jnp.float32)
    # Width interpolation: one dense MXU matmul covering all channels at once.
    y = jnp.dot(xv, awt_ref[...], preferred_element_type=jnp.float32)   # (C*H, Wo)
    ah = ah_ref[...]                                                    # load once
    # Height interpolation: per-channel matmuls, unrolled over the static
    # channel count (slices are at 8-aligned static sublane offsets).
    for c in range(C):
        yc = y[c * H:(c + 1) * H, :]                                    # (H, Wo)
        o_ref[c * Ho:(c + 1) * Ho, :] = jnp.dot(
            ah, yc, preferred_element_type=jnp.float32).astype(o_ref.dtype)


def upsample_bilinear(x, scale=2):
    """Equivalent of Upsample_(scale).forward(x) for NCHW input."""
    N, C, H, W = x.shape
    Ho, Wo = int(H * scale), int(W * scale)

    ah = jnp.asarray(_interp_matrix_np(H, Ho))        # (Ho, H)
    awt = jnp.asarray(_interp_matrix_np(W, Wo).T)     # (W, Wo)

    x2 = x.reshape(N, C * H, W)                       # free contiguous reshape

    kernel = functools.partial(_upsample_kernel, C=C, H=H, Ho=Ho)

    out2 = pl.pallas_call(
        kernel,
        out_shape=jax.ShapeDtypeStruct((N, C * Ho, Wo), x.dtype),
        grid=(N,),
        in_specs=[
            pl.BlockSpec((None, C * H, W), lambda n: (n, 0, 0)),   # one batch element
            pl.BlockSpec((Ho, H), lambda n: (0, 0)),               # Ah  (stays resident)
            pl.BlockSpec((W, Wo), lambda n: (0, 0)),               # Aw^T (stays resident)
        ],
        out_specs=pl.BlockSpec((None, C * Ho, Wo), lambda n: (n, 0, 0)),
        compiler_params=pltpu.CompilerParams(
            dimension_semantics=("parallel",)),
    )(x2, ah, awt)

    return out2.reshape(N, C, Ho, Wo)


# ---------------------------------------------------------------------------
# Pure-JAX reference (gather + lerp), same PyTorch align_corners=False rule.
# ---------------------------------------------------------------------------
def ref_upsample_bilinear(x, scale=2):
    N, C, H, W = x.shape
    Ho, Wo = int(H * scale), int(W * scale)

    def coords(in_size, out_size):
        d = jnp.arange(out_size, dtype=jnp.float32)
        s = jnp.maximum((d + 0.5) * (float(in_size) / float(out_size)) - 0.5, 0.0)
        i0 = jnp.floor(s).astype(jnp.int32)
        i1 = jnp.minimum(i0 + 1, in_size - 1)
        f = s - i0.astype(jnp.float32)
        return i0, i1, f

    y0, y1, fy = coords(H, Ho)
    x0, x1, fx = coords(W, Wo)
    fy = fy[None, None, :, None]
    xf = x.astype(jnp.float32)
    rows = xf[:, :, y0, :] * (1.0 - fy) + xf[:, :, y1, :] * fy        # (N,C,Ho,W)
    out = rows[:, :, :, x0] * (1.0 - fx) + rows[:, :, :, x1] * fx     # (N,C,Ho,Wo)
    return out.astype(x.dtype)


def _check(x, scale):
    fn = jax.jit(functools.partial(upsample_bilinear, scale=scale))
    out = jax.block_until_ready(fn(x))
    N, C, H, W = x.shape
    assert out.shape == (N, C, H * scale, W * scale)
    ref = ref_upsample_bilinear(x, scale)
    # Tolerance leaves headroom in case DEFAULT-precision f32 matmuls take a
    # bf16 MXU pass on some TPU generations; typically the error is ~1e-6.
    if not jnp.allclose(out, ref, atol=5e-3, rtol=5e-3):
        err = jnp.max(jnp.abs(out - ref))
        raise AssertionError(f"Pallas output does not match reference (max err {err})")


if __name__ == "__main__":
    key = jax.random.PRNGKey(0)

    # Primary shape consistent with the module: NCHW feature map, scale=2.
    x = jax.random.normal(key, (2, 4, 16, 16), jnp.float32)
    _check(x, scale=2)

    # Secondary (non-square, odd channel count) sanity check.
    x2 = jax.random.normal(jax.random.PRNGKey(0), (1, 3, 8, 12), jnp.float32)
    _check(x2, scale=2)

    print("KERNEL_OK")
</pallas_src>

<mosaic_0001>
module attributes {stable_mosaic.version = 11 : i64} {
  func.func @_upsample_kernel(%arg0: i32, %arg1: memref<1x64x16xf32, #tpu.memory_space<vmem>>, %arg2: memref<32x16xf32, #tpu.memory_space<vmem>>, %arg3: memref<16x32xf32, #tpu.memory_space<vmem>>, %arg4: memref<1x128x32xf32, #tpu.memory_space<vmem>>) attributes {dimension_semantics = [#tpu.dimension_semantics<parallel>], iteration_bounds = array<i64: 2>, scalar_prefetch = 0 : i64, scratch_operands = 0 : i64, tpu.core_type = #tpu.core_type<tc>, window_params = [{transform_indices = @transform_0, window_bounds = array<i64: 1, 64, 16>}, {pipeline_mode = #tpu.pipeline_mode<synchronous>, transform_indices = @transform_1, window_bounds = array<i64: 32, 16>}, {pipeline_mode = #tpu.pipeline_mode<synchronous>, transform_indices = @transform_2, window_bounds = array<i64: 16, 32>}, {transform_indices = @transform_3, window_bounds = array<i64: 1, 128, 32>}]} {
    %c0 = arith.constant 0 : index
    %c0_0 = arith.constant 0 : index
    %c0_1 = arith.constant 0 : index
    %0 = vector.load %arg1[%c0, %c0_0, %c0_1] : memref<1x64x16xf32, #tpu.memory_space<vmem>>, vector<1x64x16xf32>
    %1 = vector.shape_cast %0 : vector<1x64x16xf32> to vector<64x16xf32>
    %c0_2 = arith.constant 0 : index
    %c0_3 = arith.constant 0 : index
    %2 = vector.load %arg3[%c0_2, %c0_3] : memref<16x32xf32, #tpu.memory_space<vmem>>, vector<16x32xf32>
    %cst = arith.constant dense<0.000000e+00> : vector<64x32xf32>
    %3 = tpu.matmul %1, %2, %cst {dimension_numbers = #tpu.dot_dimension_numbers<[1], [0], [0], [1], [0, 0, 1, 1], [], []>} : vector<64x16xf32>, vector<16x32xf32>, vector<64x32xf32> -> vector<64x32xf32>
    %c0_4 = arith.constant 0 : index
    %c0_5 = arith.constant 0 : index
    %4 = vector.load %arg2[%c0_4, %c0_5] : memref<32x16xf32, #tpu.memory_space<vmem>>, vector<32x16xf32>
    %5 = vector.extract_strided_slice %3 {offsets = [0, 0], sizes = [16, 32], strides = [1, 1]} : vector<64x32xf32> to vector<16x32xf32>
    %cst_6 = arith.constant dense<0.000000e+00> : vector<32x32xf32>
    %6 = tpu.matmul %4, %5, %cst_6 {dimension_numbers = #tpu.dot_dimension_numbers<[1], [0], [0], [1], [0, 0, 1, 1], [], []>} : vector<32x16xf32>, vector<16x32xf32>, vector<32x32xf32> -> vector<32x32xf32>
    %c0_7 = arith.constant 0 : index
    %c0_8 = arith.constant 0 : index
    %c0_9 = arith.constant 0 : index
    %7 = vector.load %arg4[%c0_7, %c0_8, %c0_9] : memref<1x128x32xf32, #tpu.memory_space<vmem>>, vector<1x32x32xf32>
    %8 = vector.shape_cast %7 : vector<1x32x32xf32> to vector<32x32xf32>
    %9 = vector.shape_cast %6 : vector<32x32xf32> to vector<1x32x32xf32>
    tpu.vector_store %arg4[%c0_7, %c0_8, %c0_9], %9 {strides = array<i32>} : memref<1x128x32xf32, #tpu.memory_space<vmem>>, vector<1x32x32xf32>,
    %10 = vector.extract_strided_slice %3 {offsets = [16, 0], sizes = [16, 32], strides = [1, 1]} : vector<64x32xf32> to vector<16x32xf32>
    %cst_10 = arith.constant dense<0.000000e+00> : vector<32x32xf32>
    %11 = tpu.matmul %4, %10, %cst_10 {dimension_numbers = #tpu.dot_dimension_numbers<[1], [0], [0], [1], [0, 0, 1, 1], [], []>} : vector<32x16xf32>, vector<16x32xf32>, vector<32x32xf32> -> vector<32x32xf32>
    %c0_11 = arith.constant 0 : index
    %c32 = arith.constant 32 : index
    %c0_12 = arith.constant 0 : index
    %12 = vector.load %arg4[%c0_11, %c32, %c0_12] : memref<1x128x32xf32, #tpu.memory_space<vmem>>, vector<1x32x32xf32>
    %13 = vector.shape_cast %12 : vector<1x32x32xf32> to vector<32x32xf32>
    %14 = vector.shape_cast %11 : vector<32x32xf32> to vector<1x32x32xf32>
    tpu.vector_store %arg4[%c0_11, %c32, %c0_12], %14 {strides = array<i32>} : memref<1x128x32xf32, #tpu.memory_space<vmem>>, vector<1x32x32xf32>,
    %15 = vector.extract_strided_slice %3 {offsets = [32, 0], sizes = [16, 32], strides = [1, 1]} : vector<64x32xf32> to vector<16x32xf32>
    %cst_13 = arith.constant dense<0.000000e+00> : vector<32x32xf32>
    %16 = tpu.matmul %4, %15, %cst_13 {dimension_numbers = #tpu.dot_dimension_numbers<[1], [0], [0], [1], [0, 0, 1, 1], [], []>} : vector<32x16xf32>, vector<16x32xf32>, vector<32x32xf32> -> vector<32x32xf32>
    %c0_14 = arith.constant 0 : index
    %c64 = arith.constant 64 : index
    %c0_15 = arith.constant 0 : index
    %17 = vector.load %arg4[%c0_14, %c64, %c0_15] : memref<1x128x32xf32, #tpu.memory_space<vmem>>, vector<1x32x32xf32>
    %18 = vector.shape_cast %17 : vector<1x32x32xf32> to vector<32x32xf32>
    %19 = vector.shape_cast %16 : vector<32x32xf32> to vector<1x32x32xf32>
    tpu.vector_store %arg4[%c0_14, %c64, %c0_15], %19 {strides = array<i32>} : memref<1x128x32xf32, #tpu.memory_space<vmem>>, vector<1x32x32xf32>,
    %20 = vector.extract_strided_slice %3 {offsets = [48, 0], sizes = [16, 32], strides = [1, 1]} : vector<64x32xf32> to vector<16x32xf32>
    %cst_16 = arith.constant dense<0.000000e+00> : vector<32x32xf32>
    %21 = tpu.matmul %4, %20, %cst_16 {dimension_numbers = #tpu.dot_dimension_numbers<[1], [0], [0], [1], [0, 0, 1, 1], [], []>} : vector<32x16xf32>, vector<16x32xf32>, vector<32x32xf32> -> vector<32x32xf32>
    %c0_17 = arith.constant 0 : index
    %c96 = arith.constant 96 : index
    %c0_18 = arith.constant 0 : index
    %22 = vector.load %arg4[%c0_17, %c96, %c0_18] : memref<1x128x32xf32, #tpu.memory_space<vmem>>, vector<1x32x32xf32>
    %23 = vector.shape_cast %22 : vector<1x32x32xf32> to vector<32x32xf32>
    %24 = vector.shape_cast %21 : vector<32x32xf32> to vector<1x32x32xf32>
    tpu.vector_store %arg4[%c0_17, %c96, %c0_18], %24 {strides = array<i32>} : memref<1x128x32xf32, #tpu.memory_space<vmem>>, vector<1x32x32xf32>,
    return
  }
  func.func @transform_0(%arg0: i32) -> (i32, i32, i32) {
    %c0_i32 = arith.constant 0 : i32
    %c0_i32_0 = arith.constant 0 : i32
    %c0_i32_1 = arith.constant 0 : i32
    return %arg0, %c0_i32, %c0_i32_0 : i32, i32, i32
  }
  func.func @transform_1(%arg0: i32) -> (i32, i32) {
    %c0_i32 = arith.constant 0 : i32
    %c0_i32_0 = arith.constant 0 : i32
    %c0_i32_1 = arith.constant 0 : i32
    return %c0_i32, %c0_i32_0 : i32, i32
  }
  func.func @transform_2(%arg0: i32) -> (i32, i32) {
    %c0_i32 = arith.constant 0 : i32
    %c0_i32_0 = arith.constant 0 : i32
    %c0_i32_1 = arith.constant 0 : i32
    return %c0_i32, %c0_i32_0 : i32, i32
  }
  func.func @transform_3(%arg0: i32) -> (i32, i32, i32) {
    %c0_i32 = arith.constant 0 : i32
    %c0_i32_0 = arith.constant 0 : i32
    %c0_i32_1 = arith.constant 0 : i32
    return %arg0, %c0_i32, %c0_i32_0 : i32, i32, i32
  }
}

</mosaic_0001>

<bundles_post_ra>
// kernel: upsample_bilinear.1
= control target key start
LH: loop header
LB: loop body
LE: loop exit
PB: predicated region body
PF: predicated region fallthrough
CT: control target
= control target key end

     0   :  { %8 = vsyncpa [#allocation3], 0  ;;  %s1551_s0 = inlined_call_operand.hbm [shape: f32[2,64,16], index: 0, kind: input, shape index: {}]   ;;  %s1552_s1 = inlined_call_operand.hbm [shape: f32[32,16], index: 1, kind: input, shape index: {}]   ;;  %s1553_s2 = inlined_call_operand.hbm [shape: f32[16,32], index: 2, kind: input, shape index: {}]   ;;  %s1554_s3 = inlined_call_operand.hbm [shape: f32[2,128,32], index: 3, kind: output, shape index: {}]  }
   0x1   :  { %10 = vsyncpa [#allocation3 + $0x1], 0 }
   0x2   :  { %11 = vsyncpa [#allocation6], 0 }
   0x3   :  { %12 = vsyncpa [#allocation4], 0 }
   0x4   :  { %14 = vsyncpa [#allocation4 + $0x1], 0  ;;  %s1248_s12 = smov 0   ;;  %s1250_s13 = smov 0  }
   0x5   :  { %s1252_s14 = smov 0   ;;  %s1254_s15 = smov 0  }
   0x6 LB: > { %s1269_s16 = sadd.s32 4294967295, %s1218_s15   ;;  %s837_s17 = sadd.s32 4294967294, %s1218_s15   ;;  %s1218_s15 = sphi %s1254_s15, %s1574_s15   ;;  %s1214_s14 = sphi %s1252_s14, %s1573_s14   ;;  %s1210_s13 = sphi %s1250_s13, %s1572_s13   ;;  %s1206_s12 = sphi %s1248_s12, %s1571_s12  }
   0x7   : > { %p40_p0 = scmp.ne.s32.totalorder %s1210_s13, %s1206_s12  ;;  %p1555_p1 = scmp.eq.s32.totalorder %s1269_s16, 0 }
   0x8   : > { %p112_p3 = scmp.eq.s32.totalorder %s837_s17, 1  ;;  %p838_p5 = scmp.ge.s32.totalorder %s1218_s15, 1 }
   0x9   : > { %p1278_p4 = por %p1555_p1, %p40_p0  ;;  %p119_p7 = scmp.lt.s32.totalorder %s1218_s15, 3 }
   0xa   : > { %p1283_p6 = por %p112_p3, %p40_p0  ;;  %s1220_s21 = smov [#allocation5]  }
   0xb   : > { %s1558_s18 = scalar_select %p1278_p4, 1, 0 }
   0xc   : > { %s1559_s19 = scalar_select %p1283_p6, 1, 0 }
   0xd   : > { %p1288_p8 = pnand %p838_p5, %p119_p7  ;;  %s131_s22 = sshll.u32 %s1220_s21, 4  ;;  %s1292_s22 = int_to_ptr.vmem [resolvable:$true] %s131_s22 }
   0xe   : > { %s1221_s24 = smov [#allocation7]   ;;  %s1062_s28 = scalar_lea.hbm %s1552_s1, 512 }
   0xf   : > { %p1003_p9 = pneg %p1288_p8  ;;  %s144_s25 = sshll.u32 %s1221_s24, 4  ;;  %s1303_s25 = int_to_ptr.vmem [resolvable:$true] %s144_s25 }
  0x10   : > { %p1063_p12 = scmp.ne.s32.totalorder %s1552_s1, %s1062_s28  ;;  %p1069_p5 = scmp.lt.u32.totalorder %s1062_s28, %s1552_s1 }
  0x11   : > { %p1299_p11 = pnand %p1003_p9, %p1555_p1 }
  0x13   : > { %p1064_p13 = pneg %p1299_p11 }
  0x15   : > { %p1065_p0 = pnand %p1064_p13, %p1063_p12 }
  0x17   : > { %p1066_p3 = pneg %p1065_p0 }
  0x19   : > { %p1071_p7 = pnand %p1069_p5, %p1066_p3 }
  0x1b   : > { %1074 = shalt.err (!%p1071_p7)
}
  0x1c   : > { %s1075_s6 = scalar_lea.vmem %s1292_s22, 512  ;;  %p1083_p2 = scmp.lt.s32.totalorder %s1292_s22, %s1292_s22 }
  0x1d   : > { %p1076_p9 = scmp.ne.s32.totalorder %s1292_s22, %s1075_s6  ;;  %p1084_p12 = scmp.lt.s32.totalorder %s1075_s6, %s1075_s6 }
  0x1f   : > { %p1078_p10 = pnand %p1076_p9, %p1064_p13  ;;  %p1085_p0 = por %p1084_p12, %p1083_p2 }
  0x21   : > { %p1079_p1 = pneg %p1078_p10 }
  0x23   : > { %p1086_p6 = pnand %p1085_p0, %p1079_p1 }
  0x25   : > { %1089 = shalt.err (!%p1086_p6)
}
  0x26   : > { %s1222_s7 = smov 128   ;;  %s1223_s8 = smov 8  }
  0x27   : > { %1006 = dma.hbm_to_vmem [thread:$0]  (!%p1299_p11), %s1552_s1, 512, %s1292_s22, [#allocation6], %s1222_s7, %s1222_s7, %s1223_s8  }
  0x28   : > { %s1090_s21 = scalar_lea.hbm %s1553_s2, 256 }
  0x29   : > { %p1091_p1 = scmp.ne.s32.totalorder %s1553_s2, %s1090_s21  ;;  %p1097_p10 = scmp.lt.u32.totalorder %s1090_s21, %s1553_s2 }
  0x2b   : > { %p1093_p2 = pnand %p1091_p1, %p1064_p13 }
  0x2d   : > { %p1094_p6 = pneg %p1093_p2 }
  0x2f   : > { %p1099_p3 = pnand %p1097_p10, %p1094_p6 }
  0x31   : > { %1102 = shalt.err (!%p1099_p3)
}
  0x32   : > { %s1103_s22 = scalar_lea.vmem %s1303_s25, 256  ;;  %p1111_p12 = scmp.lt.s32.totalorder %s1303_s25, %s1303_s25 }
  0x33   : > { %p1104_p5 = scmp.ne.s32.totalorder %s1303_s25, %s1103_s22  ;;  %p1112_p0 = scmp.lt.s32.totalorder %s1103_s22, %s1103_s22 }
  0x35   : > { %p1106_p7 = pnand %p1104_p5, %p1064_p13  ;;  %p1113_p1 = por %p1112_p0, %p1111_p12 }
  0x37   : > { %p1107_p9 = pneg %p1106_p7 }
  0x39   : > { %p1114_p2 = pnand %p1113_p1, %p1107_p9 }
  0x3b   : > { %1117 = shalt.err (!%p1114_p2)
}
  0x3c   : > { %1009 = dma.hbm_to_vmem [thread:$0]  (!%p1299_p11), %s1553_s2, 256, %s1303_s25, [#allocation6], %s1222_s7, %s1222_s7, %s1223_s8  }
  0x3d   : > { %s1364_s23 = sadd.s32 1, %s1218_s15   ;;  %s27_s4 = sadd.s32 1, %s1214_s14 }
  0x3e   : > { %s24_s5 = ssub.s32 %s1218_s15, %s1364_s23  ;;  %p34_p13 = scmp.ne.s32.totalorder %s1214_s14, %s1210_s13 }
  0x3f   : > { %p25_p6 = scmp.eq.s32.totalorder %s24_s5, 0  ;;  %p35_p10 = scmp.eq.s32.totalorder %s1218_s15, 0 }
  0x40   : > { %p1562_p3 = scmp.eq.s32.totalorder %s1269_s16, 1  ;;  %p1020_p7 = scmp.lt.s32.totalorder %s1218_s15, 2 }
  0x41   : > { %s1380_s9 = scalar_select %p25_p6, %s1214_s14, %s27_s4  }
  0x42   : > { %p1374_p5 = por %p1562_p3, %p34_p13  ;;  %p36_p9 = por %p35_p10, %p34_p13 }
  0x43   : > { %s158_s10 = sand.u32 1, %s1214_s14   ;;  %s879_s25 = sshll.u32 %s1218_s15, 10 }
  0x44   : > { %s1563_s6 = scalar_select %p1374_p5, 1, 0 }
  0x45   : > { %s842_s11 = sshll.u32 %s158_s10, 6  ;;  %s1387_s24 = scalar_lea.hbm %s1551_s0, %s879_s25 }
  0x46   : > { %s162_s26 = scalar_lea.vmem [#allocation2], %s842_s11  ;;  %p1391_p11 = pnand %p1020_p7, %p36_p9 }
  0x47   : > { %s169_s27 = sshll.u32 %s162_s26, 4  ;;  %s1395_s22 = scalar_lea.sflag [#allocation3], %s158_s10  ;;  %s1389_s27 = int_to_ptr.vmem [resolvable:$true] %s169_s27 }
  0x48   : > { %s1118_s29 = scalar_lea.hbm %s1387_s24, 1024  ;;  %p1120_p0 = pneg %p1391_p11 }
  0x49   : > { %p1119_p12 = scmp.ne.s32.totalorder %s1387_s24, %s1118_s29  ;;  %s1123_s5 = scalar_lea.hbm %s1551_s0, 2048 }
  0x4a   : > { %p1124_p13 = scmp.lt.u32.totalorder %s1387_s24, %s1551_s0  ;;  %p1125_p6 = scmp.lt.u32.totalorder %s1123_s5, %s1118_s29 }
  0x4b   : > { %p1121_p1 = pnand %p1120_p0, %p1119_p12  ;;  %p1127_p3 = scmp.lt.u32.totalorder %s1118_s29, %s1387_s24 }
  0x4c   : > { %p1126_p10 = por %p1125_p6, %p1124_p13 }
  0x4d   : > { %p1122_p2 = pneg %p1121_p1 }
  0x4e   : > { %p1128_p7 = por %p1127_p3, %p1126_p10 }
  0x50   : > { %p1129_p9 = pnand %p1128_p7, %p1122_p2 }
  0x52   : > { %1132 = shalt.err (!%p1129_p9)
}
  0x53   : > { %s1133_s10 = scalar_lea.vmem %s1389_s27, 1024  ;;  %s1224_s17 = smov [#allocation2]  }
  0x54   : > { %p1134_p12 = scmp.ne.s32.totalorder %s1389_s27, %s1133_s10  ;;  %s1138_s21 = sshll.u32 %s1224_s17, 4  ;;  %s1139_s21 = int_to_ptr.vmem [resolvable:$false] %s1138_s21 }
  0x55   : > { %s1140_s26 = scalar_lea.vmem %s1139_s21, 2048  ;;  %p1141_p4 = scmp.lt.s32.totalorder %s1389_s27, %s1139_s21 }
  0x56   : > { %p1136_p1 = pnand %p1134_p12, %p1120_p0  ;;  %p1142_p13 = scmp.lt.s32.totalorder %s1140_s26, %s1133_s10 }
  0x58   : > { %p1137_p5 = pneg %p1136_p1  ;;  %p1143_p6 = por %p1142_p13, %p1141_p4 }
  0x5a   : > { %p1144_p10 = pnand %p1143_p6, %p1137_p5 }
  0x5c   : > { %1147 = shalt.err (!%p1144_p10)
}
  0x5d   : > { %1013 = dma.hbm_to_vmem [thread:$0]  (!%p1391_p11), %s1387_s24, 1024, %s1389_s27, %s1395_s22, %s1222_s7, %s1222_s7, %s1223_s8  }
  0x5e   : > { %181 = sbr.rel (%p1288_p8) target bundleno = 579 (0x243), region = 32  ;;  %s1429_s29 = sand.u32 (!%p1288_p8), 1, %s1210_s13  }
  0x5f   : > { %s846_s30 = sshll.u32 (!%p1288_p8), %s1429_s29, 6  ;;  %s184_s4 = scalar_lea.sflag (!%p1288_p8), [#allocation3], %s1429_s29 }
  0x60   : > { %s187_s5 = scalar_lea.vmem (!%p1288_p8), [#allocation2], %s846_s30  ;;  %p1565_p4 = scmp.ne.s32.totalorder (!%p1288_p8), %s1558_s18, 0 }
  0x65   : > { %1193 = dma.done.wait (%p1565_p4), %s184_s4, 1024  }
  0x66   : > { %1195 = vsyncadd (%p1565_p4), %s184_s4, 4294966272  ;;  %p1566_p5 = scmp.eq.s32.totalorder %s1269_s16, 0 }
  0x68   : > { %1197 = dma.done.wait (%p1566_p5), [#allocation6], 768   ;;  %p1567_p11 = pmov %p1566_p5 }
  0x69   : > { %vm228_vm0 = vcmask 130048   ;;  %v226_v0 = vld [vmem:[#allocation7] sm:$0xff]  ;;  %v227_v1 = vld [vmem:[#allocation7 + $0x8] sm:$0xff]  ;;  %v220_v5 = vld [vmem:[%s187_s5 + $0x10] sm:$0xff]  ;;  %s849_s18 = sshll.u32 %s1429_s29, 7  ;;  %vm459_vm1 = vcmask 261120  }
  0x6a   : > { %1199 = vsyncadd (%p1567_p11), [#allocation6], 4294966528  ;;  %v218_v2 = vld [vmem:[%s187_s5] sm:$0xff]  ;;  %v971_v3 = vpack.c.bf16 %v227_v1, %v226_v0  ;;  %v219_v4 = vld [vmem:[%s187_s5 + $0x8] sm:$0xff]  ;;  %s1466_s20 = scalar_lea.vmem [#allocation8], %s849_s18  ;;  %s880_s7 = sshll.u32 %s1269_s16, 11 }
  0x6b   : > { %919 = vmatprep.mubr.msk.f32.mxu0 %vm228_vm0, %v218_v2  ;;  %v221_v6 = vld [vmem:[%s187_s5 + $0x18] sm:$0xff]  ;;  %v222_v7 = vld [vmem:[%s187_s5 + $0x20] sm:$0xff]  ;;  %v223_v8 = vld [vmem:[%s187_s5 + $0x28] sm:$0xff]  ;;  %s745_s8 = sshll.u32 %s1466_s20, 4  ;;  %s1501_s28 = scalar_lea.hbm %s1554_s3, %s880_s7  ;;  %s1503_s8 = int_to_ptr.vmem [resolvable:$true] %s745_s8 }
  0x6c   : > { %972 = vmatprep.subr.bf16.mxu0 %v971_v3  ;;  %v224_v9 = vld [vmem:[%s187_s5 + $0x30] sm:$0xff]  ;;  %v225_v10 = vld [vmem:[%s187_s5 + $0x38] sm:$0xff]  ;;  %v358_v11 = vld [vmem:[#allocation5] sm:$0xff]  ;;  %s732_s16 = scalar_lea.sflag [#allocation4], %s1429_s29  ;;  %s1148_s22 = scalar_lea.vmem %s1503_s8, 2048 }
  0x6d   : > { %974 = vmatpush3.bf16.msra.mxu0 %v971_v3  ;;  %935 = vmatprep.mubr.msk.f32.mxu1 %vm228_vm0, %v358_v11  ;;  %v359_v17 = vld [vmem:[#allocation5 + $0x8] sm:$0xff]  ;;  %v360_v19 = vld [vmem:[#allocation5 + $0x10] sm:$0xff]  ;;  %v361_v22 = vld [vmem:[#allocation5 + $0x18] sm:$0xff]  ;;  %p1149_p8 = scmp.ne.s32.totalorder %s1503_s8, %s1148_s22  ;;  %p1568_p0 = scmp.ne.s32.totalorder %s1563_s6, 0 }
  0x6e   : > { %s1225_s11 = smov [#allocation8]  }
  0x6f   : > { %p1150_p2 = pnand %p1149_p8, %p1568_p0  ;;  %s1152_s25 = sshll.u32 %s1225_s11, 4  ;;  %s1153_s25 = int_to_ptr.vmem [resolvable:$false] %s1152_s25 }
  0x70   : > { %920 = vmatmul.mubr.msk.f32.vlgmr.msra.gmra.mrb[0].mxu0 %vm228_vm0, %v219_v4  ;;  %s1154_s10 = scalar_lea.vmem %s1153_s25, 4096  ;;  %p1155_p7 = scmp.lt.s32.totalorder %s1503_s8, %s1153_s25 }
  0x71   : > { %922 = vmatprep.mubr.msk.f32.mxu0 %vm228_vm0, %v220_v5  ;;  %p1151_p3 = pneg %p1150_p2  ;;  %p1156_p9 = scmp.lt.s32.totalorder %s1154_s10, %s1148_s22 }
  0x73   : > { %p1157_p12 = por %p1156_p9, %p1155_p7 }
  0x74   : > { %923 = vmatmul.mubr.msk.f32.gmra.mrb[2].mxu0 %vm228_vm0, %v221_v6 }
  0x75   : > { %925 = vmatprep.mubr.msk.f32.mxu0 %vm228_vm0, %v222_v7  ;;  %p1158_p1 = pnand %p1157_p12, %p1151_p3 }
  0x78   : > { %926 = vmatmul.mubr.msk.f32.gmra.mrb[4].mxu0 %vm228_vm0, %v223_v8 }
  0x79   : > { %928 = vmatprep.mubr.msk.f32.mxu0 %vm228_vm0, %v224_v9 }
  0x7c   : > { %929 = vmatmul.mubr.msk.f32.gmra.mrb[6].mxu0 %vm228_vm0, %v225_v10 }
  0x7d   : > { %955 = vmatprep.mubr.msk.f32.mxu0 %vm228_vm0, %v358_v11 }
 0x143   : > { %v921_v12 = vpop.f32.mrb[0].mxu0 }
 0x144   : > { %v319_v13 = vpop.f32.mrb[1].mxu0 }
 0x145   : > { %v975_v14 = vpack.c.bf16 %v921_v12, %v319_v13 }
 0x147   : > { %v924_v15 = vpop.f32.mrb[2].mxu0  ;;  %976 = vmatprep.subr.bf16.mxu1 %v975_v14 }
 0x148   : > { %v329_v16 = vpop.f32.mrb[3].mxu0  ;;  %978 = vmatpush3.bf16.msra.mxu1 %v975_v14 }
 0x149   : > { %v979_v18 = vpack.c.bf16 %v924_v15, %v329_v16 }
 0x14b   : > { %v927_v20 = vpop.f32.mrb[4].mxu0  ;;  %980 = vmatprep.subr.bf16.mxu1 %v979_v18  ;;  %936 = vmatmul.mubr.msk.f32.vlgmr.msra.gmra.mrb[0].mxu1 %vm228_vm0, %v359_v17 }
 0x14c   : > { %v339_v21 = vpop.f32.mrb[5].mxu0  ;;  %982 = vmatpush3.bf16.msra.mxu1 %v979_v18  ;;  %938 = vmatprep.mubr.msk.f32.mxu1 %vm228_vm0, %v360_v19 }
 0x14d   : > { %v983_v23 = vpack.c.bf16 %v927_v20, %v339_v21 }
 0x14f   : > { %984 = vmatprep.subr.bf16.mxu0 %v983_v23  ;;  %v930_v24 = vpop.f32.mrb[6].mxu0  ;;  %939 = vmatmul.mubr.msk.f32.gmra.mrb[2].mxu1 %vm228_vm0, %v361_v22 }
 0x150   : > { %986 = vmatpush3.bf16.msra.mxu0 %v983_v23  ;;  %v349_v25 = vpop.f32.mrb[7].mxu0  ;;  %945 = vmatprep.mubr.msk.f32.mxu1 %vm228_vm0, %v358_v11 }
 0x151   : > { %v987_v26 = vpack.c.bf16 %v930_v24, %v349_v25 }
 0x153   : > { %988 = vmatprep.subr.bf16.mxu1 %v987_v26  ;;  %946 = vmatmul.mubr.msk.f32.vlgmr.msra.gmra.mrb[4].mxu1 %vm228_vm0, %v359_v17 }
 0x154   : > { %990 = vmatpush3.bf16.msra.mxu1 %v987_v26  ;;  %948 = vmatprep.mubr.msk.f32.mxu1 %vm228_vm0, %v360_v19 }
 0x155   : > { %956 = vmatmul.mubr.msk.f32.vlgmr.msra.gmra.mrb[8].mxu0 %vm228_vm0, %v359_v17 }
 0x156   : > { %958 = vmatprep.mubr.msk.f32.mxu0 %vm228_vm0, %v360_v19 }
 0x157   : > { %949 = vmatmul.mubr.msk.f32.gmra.mrb[6].mxu1 %vm228_vm0, %v361_v22 }
 0x158   : > { %965 = vmatprep.mubr.msk.f32.mxu1 %vm228_vm0, %v358_v11 }
 0x159   : > { %959 = vmatmul.mubr.msk.f32.gmra.mrb[10].mxu0 %vm228_vm0, %v361_v22 }
 0x15b   : > { %966 = vmatmul.mubr.msk.f32.vlgmr.msra.gmra.mrb[8].mxu1 %vm228_vm0, %v359_v17 }
 0x15c   : > { %968 = vmatprep.mubr.msk.f32.mxu1 %vm228_vm0, %v360_v19 }
 0x15f   : > { %969 = vmatmul.mubr.msk.f32.gmra.mrb[10].mxu1 %vm228_vm0, %v361_v22 }
 0x21e   : > { %v937_v27 = vpop.f32.mrb[0].mxu1 }
 0x21f   : > { %461 = vst.msk [vmem:[%s1466_s20 + $0x8] sm:$0xff] %vm459_vm1, %v937_v27  ;;  %v440_v28 = vpop.f32.mrb[1].mxu1 }
 0x220   : > { %460 = vst.msk [vmem:[%s1466_s20] sm:$0xff] %vm459_vm1, %v440_v28 }
 0x222   : > { %v940_v29 = vpop.f32.mrb[2].mxu1 }
 0x223   : > { %463 = vst.msk [vmem:[%s1466_s20 + $0x18] sm:$0xff] %vm459_vm1, %v940_v29  ;;  %v450_v30 = vpop.f32.mrb[3].mxu1 }
 0x224   : > { %462 = vst.msk [vmem:[%s1466_s20 + $0x10] sm:$0xff] %vm459_vm1, %v450_v30 }
 0x226   : > { %v947_v31 = vpop.f32.mrb[4].mxu1 }
 0x227   : > { %550 = vst.msk [vmem:[%s1466_s20 + $0x28] sm:$0xff] %vm459_vm1, %v947_v31  ;;  %v530_v32 = vpop.f32.mrb[5].mxu1 }
 0x228   : > { %549 = vst.msk [vmem:[%s1466_s20 + $0x20] sm:$0xff] %vm459_vm1, %v530_v32  ;;  %v957_v33 = vpop.f32.mrb[8].mxu0 }
 0x229   : > { %639 = vst.msk [vmem:[%s1466_s20 + $0x48] sm:$0xff] %vm459_vm1, %v957_v33  ;;  %v619_v34 = vpop.f32.mrb[9].mxu0 }
 0x22a   : > { %v950_v35 = vpop.f32.mrb[6].mxu1  ;;  %638 = vst.msk [vmem:[%s1466_s20 + $0x40] sm:$0xff] %vm459_vm1, %v619_v34 }
 0x22b   : > { %552 = vst.msk [vmem:[%s1466_s20 + $0x38] sm:$0xff] %vm459_vm1, %v950_v35  ;;  %v540_v36 = vpop.f32.mrb[7].mxu1 }
 0x22c   : > { %551 = vst.msk [vmem:[%s1466_s20 + $0x30] sm:$0xff] %vm459_vm1, %v540_v36  ;;  %v960_v37 = vpop.f32.mrb[10].mxu0 }
 0x22d   : > { %641 = vst.msk [vmem:[%s1466_s20 + $0x58] sm:$0xff] %vm459_vm1, %v960_v37  ;;  %v629_v38 = vpop.f32.mrb[11].mxu0 }
 0x22e   : > { %v967_v39 = vpop.f32.mrb[8].mxu1  ;;  %640 = vst.msk [vmem:[%s1466_s20 + $0x50] sm:$0xff] %vm459_vm1, %v629_v38 }
 0x22f   : > { %728 = vst.msk [vmem:[%s1466_s20 + $0x68] sm:$0xff] %vm459_vm1, %v967_v39  ;;  %v708_v40 = vpop.f32.mrb[9].mxu1 }
 0x230   : > { %727 = vst.msk [vmem:[%s1466_s20 + $0x60] sm:$0xff] %vm459_vm1, %v708_v40 }
 0x232   : > { %v970_v41 = vpop.f32.mrb[10].mxu1 }
 0x233   : > { %730 = vst.msk [vmem:[%s1466_s20 + $0x78] sm:$0xff] %vm459_vm1, %v970_v41  ;;  %v718_v42 = vpop.f32.mrb[11].mxu1 }
 0x234   : > { %729 = vst.msk [vmem:[%s1466_s20 + $0x70] sm:$0xff] %vm459_vm1, %v718_v42 }
 0x235   : > { %1161 = shalt.err (!%p1158_p1)
}
 0x236   : > { %s1162_s17 = scalar_lea.hbm %s1501_s28, 2048  ;;  %s1166_s30 = scalar_lea.hbm %s1554_s3, 4096 }
 0x237   : > { %p1163_p13 = scmp.ne.s32.totalorder %s1501_s28, %s1162_s17  ;;  %p1167_p4 = scmp.lt.u32.totalorder %s1501_s28, %s1554_s3 }
 0x238   : > { %p1168_p5 = scmp.lt.u32.totalorder %s1166_s30, %s1162_s17  ;;  %p1170_p8 = scmp.lt.u32.totalorder %s1162_s17, %s1501_s28 }
 0x239   : > { %p1164_p6 = pnand %p1163_p13, %p1568_p0 }
 0x23a   : > { %p1169_p11 = por %p1168_p5, %p1167_p4 }
 0x23b   : > { %p1165_p10 = pneg %p1164_p6 }
 0x23c   : > { %p1171_p2 = por %p1170_p8, %p1169_p11 }
 0x23e   : > { %p1172_p3 = pnand %p1171_p2, %p1165_p10 }
 0x240   : > { %1175 = shalt.err (!%p1172_p3)
}
 0x241   : > { %s1226_s18 = smov 128   ;;  %s1227_s20 = smov 8  }
 0x242   : > { %1001 = dma.vmem_to_hbm [thread:$0]  (%p1568_p0), %s1503_s8, 2048, %s1501_s28, %s732_s16, %s1226_s18, %s1226_s18, %s1227_s20  }
 0x243 PF: > { %s760_s7 = sand.u32 1, %s1206_s12   ;;  %p1569_p7 = scmp.ne.s32.totalorder %s1559_s19, 0 }
 0x244   : > { %p1570_p9 = scmp.ge.s32.totalorder %s1218_s15, 2  ;;  %s761_s24 = scalar_lea.sflag [#allocation4], %s760_s7 }
 0x246   : > { %p1015_p12 = pnand %p1570_p9, %p1569_p7 }
 0x248   : > { %1201 = dma.done.wait (!%p1015_p12), %s761_s24, 2048  }
 0x249   : > { %1203 = vsyncadd (!%p1015_p12), %s761_s24, 4294965248  ;;  %p17_p1 = scmp.ge.s32.totalorder %s1364_s23, 4   ;;  %s1571_s12 = smov %s1210_s13 }
 0x24a   : > { %s1572_s13 = smov %s1214_s14  ;;  %s1573_s14 = smov %s1380_s9 }
 0x24b   : > { %s1574_s15 = smov %s1364_s23  ;;  %19 = sbr.rel (!%p17_p1) target bundleno = 6 (0x6), region = 85 }
 0x252   :  { %766 = vsyncpa [#allocation3], 1 }
 0x253   :  { %768 = vsyncpa [#allocation3 + $0x1], 1 }
 0x254   :  { %769 = vsyncpa [#allocation6], 1 }
 0x255   :  { %770 = vsyncpa [#allocation4], 1 }
 0x256   :  { %772 = vsyncpa [#allocation4 + $0x1], 1 }

</bundles_post_ra>
